<compile_context>
chip_gen: v7x
topology: tpu7x:2x2x1
jax: 0.10.0
libtpu: 0.0.40
codegen_flags: <defaults>
</compile_context>

<pallas_src>
import jax
import jax.numpy as jnp
from jax.experimental import pallas as pl
from jax.experimental.pallas import tpu as pltpu


def _ensemble_kernel(counts_ref, emb_ref, w_ref, bmean_ref, out_ref, pooled_ref):
    """One grid step = (batch tile bt, sub-model m, vocab tile v).

    counts_ref : (Bt, Vt)     f32  normalized weighted token counts (shared)
    emb_ref    : (1, Vt, H)   f32  this model's embedding-table chunk
    w_ref      : (1, H, Cp)   f32  this model's classifier weight (C padded)
    bmean_ref  : (1, Cp)      f32  mean bias over the ensemble
    out_ref    : (Bt, Cp)     f32  averaged logits (accumulated across m)
    pooled_ref : (Bt, H)      f32  VMEM scratch: pooled features for model m
    """
    m = pl.program_id(1)
    v = pl.program_id(2)
    n_m = pl.num_programs(1)
    n_v = pl.num_programs(2)

    # output block is VMEM-resident across both reduction axes (m, v)
    @pl.when((m == 0) & (v == 0))
    def _():
        out_ref[...] = jnp.zeros_like(out_ref)

    @pl.when(v == 0)
    def _():
        pooled_ref[...] = jnp.zeros_like(pooled_ref)

    # masked mean pooling as an MXU matmul: (Bt, Vt) @ (Vt, H)
    pooled_ref[...] += jnp.dot(counts_ref[...], emb_ref[0],
                               preferred_element_type=jnp.float32)

    @pl.when(v == n_v - 1)
    def _():
        # classifier head for model m, accumulated into the ensemble sum
        out_ref[...] += jnp.dot(pooled_ref[...], w_ref[0],
                                preferred_element_type=jnp.float32)

    @pl.when((m == n_m - 1) & (v == n_v - 1))
    def _():
        # ensemble mean + hoisted mean bias (== mean of per-model bias adds)
        out_ref[...] = out_ref[...] / n_m + bmean_ref[...]


def integrated_model_forward(input_ids, attention_mask, embeddings, weights, biases):
    """Ensemble forward: mean over per-model logits.

    input_ids      : (B, S)    int32
    attention_mask : (B, S)    int / float
    embeddings     : (M, V, H) float32   (per-model embedding tables)
    weights        : (M, H, C) float32   (per-model classifier weights)
    biases         : (M, C)    float32
    returns        : (B, C)    float32
    """
    M, V, H = embeddings.shape
    B, S = input_ids.shape
    C = weights.shape[-1]

    # ---- wrapper-side prep (cheap, shared across the ensemble) ----------------
    mask = attention_mask.astype(jnp.float32)
    denom = jnp.maximum(jnp.sum(mask, axis=1, keepdims=True), 1.0)     # (B, 1)
    mask_norm = mask / denom                                           # (B, S)
    # counts[b, v] = sum_s mask_norm[b, s] * one_hot(ids[b, s], V)
    one_hot = jax.nn.one_hot(input_ids, V, dtype=jnp.float32)          # (B, S, V)
    counts = jnp.einsum('bs,bsv->bv', mask_norm, one_hot)              # (B, V)
    # TODO(synk): for very large vocabularies build `counts` with a scatter-add
    # instead of a dense one-hot.

    # Pad the classifier dim to a lane-dense multiple of 128; slice afterwards.
    c_pad = ((C + 127) // 128) * 128
    w_p = jnp.pad(weights, ((0, 0), (0, 0), (0, c_pad - C)))           # (M, H, Cp)
    b_mean = jnp.pad(jnp.mean(biases, axis=0), (0, c_pad - C))[None]   # (1, Cp)

    # ---- tiling ---------------------------------------------------------------
    # Batch tile (parallel axis -> both v7x TensorCores); must be mult. of 8 or full.
    bt = B
    if B % 8 == 0:
        cand = min(B, 512)
        while B % cand != 0:
            cand -= 8
        bt = cand
    n_bt = B // bt

    # Vocab tile so the (Vt, H) f32 embedding chunk (double-buffered) stays well
    # under the scoped-VMEM default; must be a multiple of 128 or the full V.
    vt = V
    if V % 128 == 0:
        cand = max(128, min(V, ((8 * 1024 * 1024) // (H * 4)) // 128 * 128))
        if V % cand == 0:
            vt = cand
    n_vt = V // vt

    grid_spec = pltpu.PrefetchScalarGridSpec(
        num_scalar_prefetch=0,
        grid=(n_bt, M, n_vt),
        in_specs=[
            pl.BlockSpec((bt, vt), lambda b, m, v: (b, v)),        # counts (shared)
            pl.BlockSpec((1, vt, H), lambda b, m, v: (m, v, 0)),   # embedding chunk
            pl.BlockSpec((1, H, c_pad), lambda b, m, v: (m, 0, 0)),  # classifier W
            pl.BlockSpec((1, c_pad), lambda b, m, v: (0, 0)),      # mean bias
        ],
        out_specs=pl.BlockSpec((bt, c_pad), lambda b, m, v: (b, 0)),
        scratch_shapes=[pltpu.VMEM((bt, H), jnp.float32)],
    )

    out_padded = pl.pallas_call(
        _ensemble_kernel,
        out_shape=jax.ShapeDtypeStruct((B, c_pad), jnp.float32),
        grid_spec=grid_spec,
        compiler_params=pltpu.CompilerParams(
            dimension_semantics=("parallel", "arbitrary", "arbitrary")),
    )(counts, embeddings, w_p, b_mean)

    return out_padded[:, :C]


def _reference_forward(input_ids, attention_mask, embeddings, weights, biases):
    """Pure-JAX reference of IntegratedModel.forward with the same sub-models."""
    mask = attention_mask.astype(jnp.float32)
    outs = []
    for m in range(embeddings.shape[0]):
        emb = jnp.take(embeddings[m], input_ids, axis=0)                  # (B, S, H)
        summed = jnp.sum(emb * mask[:, :, None], axis=1)                  # (B, H)
        pooled = summed / jnp.maximum(jnp.sum(mask, axis=1, keepdims=True), 1.0)
        outs.append(pooled @ weights[m] + biases[m])
    return jnp.mean(jnp.stack(outs, axis=0), axis=0)                      # torch.mean(stack, 0)


if __name__ == "__main__":
    # small shapes: M=3 ensemble members, batch=2, seq=8, hidden=32, vocab=16, classes=4
    M, B, S, H, V, C = 3, 2, 8, 32, 16, 4

    key = jax.random.PRNGKey(0)
    k_ids, k_emb, k_w, k_b = jax.random.split(key, 4)

    input_ids = jax.random.randint(k_ids, (B, S), 0, V, dtype=jnp.int32)
    attention_mask = jnp.concatenate(
        [jnp.ones((B, S - 2), jnp.int32), jnp.zeros((B, 2), jnp.int32)], axis=1)

    embeddings = 0.02 * jax.random.normal(k_emb, (M, V, H), jnp.float32)
    weights = 0.1 * jax.random.normal(k_w, (M, H, C), jnp.float32)
    biases = 0.01 * jax.random.normal(k_b, (M, C), jnp.float32)

    out = integrated_model_forward(input_ids, attention_mask,
                                   embeddings, weights, biases)
    out = jax.block_until_ready(out)

    ref = _reference_forward(input_ids, attention_mask,
                             embeddings, weights, biases)
    assert out.shape == (B, C)
    assert jnp.allclose(out, ref, atol=1e-5, rtol=1e-5)

    print("KERNEL_OK")
</pallas_src>

<mosaic_0001>
module attributes {stable_mosaic.version = 11 : i64} {
  func.func @_ensemble_kernel(%arg0: i32, %arg1: i32, %arg2: i32, %arg3: memref<2x16xf32, #tpu.memory_space<vmem>>, %arg4: memref<1x16x32xf32, #tpu.memory_space<vmem>>, %arg5: memref<1x32x128xf32, #tpu.memory_space<vmem>>, %arg6: memref<1x128xf32, #tpu.memory_space<vmem>>, %arg7: memref<2x128xf32, #tpu.memory_space<vmem>>, %arg8: memref<2x32xf32, #tpu.memory_space<vmem>>) attributes {dimension_semantics = [#tpu.dimension_semantics<parallel>, #tpu.dimension_semantics<arbitrary>, #tpu.dimension_semantics<arbitrary>], iteration_bounds = array<i64: 1, 3, 1>, scalar_prefetch = 0 : i64, scratch_operands = 1 : i64, tpu.core_type = #tpu.core_type<tc>, window_params = [{transform_indices = @transform_0, window_bounds = array<i64: 2, 16>}, {transform_indices = @transform_1, window_bounds = array<i64: 1, 16, 32>}, {transform_indices = @transform_2, window_bounds = array<i64: 1, 32, 128>}, {pipeline_mode = #tpu.pipeline_mode<synchronous>, transform_indices = @transform_3, window_bounds = array<i64: 1, 128>}, {transform_indices = @transform_4, window_bounds = array<i64: 2, 128>}]} {
    %c0_i32 = arith.constant 0 : i32
    %0 = arith.cmpi eq, %arg1, %c0_i32 : i32
    %c0_i32_0 = arith.constant 0 : i32
    %1 = arith.cmpi eq, %arg2, %c0_i32_0 : i32
    %2 = arith.andi %0, %1 : i1
    %3 = arith.extui %2 : i1 to i32
    %c0_i32_1 = arith.constant 0 : i32
    %4 = arith.cmpi ne, %3, %c0_i32_1 : i32
    scf.if %4 {
      %cst_16 = arith.constant 0.000000e+00 : f32
      %23 = vector.broadcast %cst_16 : f32 to vector<2x128xf32>
      %c0_17 = arith.constant 0 : index
      %c0_18 = arith.constant 0 : index
      %24 = vector.load %arg7[%c0_17, %c0_18] : memref<2x128xf32, #tpu.memory_space<vmem>>, vector<2x128xf32>
      tpu.vector_store %arg7[%c0_17, %c0_18], %23 {strides = array<i32>} : memref<2x128xf32, #tpu.memory_space<vmem>>, vector<2x128xf32>,
    } else {
    }
    %c0_i32_2 = arith.constant 0 : i32
    %5 = arith.cmpi eq, %arg2, %c0_i32_2 : i32
    %6 = arith.extui %5 : i1 to i32
    %c0_i32_3 = arith.constant 0 : i32
    %7 = arith.cmpi ne, %6, %c0_i32_3 : i32
    scf.if %7 {
      %cst_16 = arith.constant 0.000000e+00 : f32
      %23 = vector.broadcast %cst_16 : f32 to vector<2x32xf32>
      %c0_17 = arith.constant 0 : index
      %c0_18 = arith.constant 0 : index
      %24 = vector.load %arg8[%c0_17, %c0_18] : memref<2x32xf32, #tpu.memory_space<vmem>>, vector<2x32xf32>
      tpu.vector_store %arg8[%c0_17, %c0_18], %23 {strides = array<i32>} : memref<2x32xf32, #tpu.memory_space<vmem>>, vector<2x32xf32>,
    } else {
    }
    %c0 = arith.constant 0 : index
    %c0_4 = arith.constant 0 : index
    %8 = vector.load %arg8[%c0, %c0_4] : memref<2x32xf32, #tpu.memory_space<vmem>>, vector<2x32xf32>
    %c0_5 = arith.constant 0 : index
    %c0_6 = arith.constant 0 : index
    %9 = vector.load %arg3[%c0_5, %c0_6] : memref<2x16xf32, #tpu.memory_space<vmem>>, vector<2x16xf32>
    %c0_7 = arith.constant 0 : index
    %c0_8 = arith.constant 0 : index
    %c0_9 = arith.constant 0 : index
    %10 = vector.load %arg4[%c0_7, %c0_8, %c0_9] : memref<1x16x32xf32, #tpu.memory_space<vmem>>, vector<1x16x32xf32>
    %11 = vector.shape_cast %10 : vector<1x16x32xf32> to vector<16x32xf32>
    %cst = arith.constant dense<0.000000e+00> : vector<2x32xf32>
    %12 = tpu.matmul %9, %11, %cst {dimension_numbers = #tpu.dot_dimension_numbers<[1], [0], [0], [1], [0, 0, 1, 1], [], []>} : vector<2x16xf32>, vector<16x32xf32>, vector<2x32xf32> -> vector<2x32xf32>
    %13 = arith.addf %8, %12 : vector<2x32xf32>
    %c0_10 = arith.constant 0 : index
    %c0_11 = arith.constant 0 : index
    %14 = vector.load %arg8[%c0_10, %c0_11] : memref<2x32xf32, #tpu.memory_space<vmem>>, vector<2x32xf32>
    tpu.vector_store %arg8[%c0_10, %c0_11], %13 {strides = array<i32>} : memref<2x32xf32, #tpu.memory_space<vmem>>, vector<2x32xf32>,
    %c0_i32_12 = arith.constant 0 : i32
    %15 = arith.cmpi eq, %arg2, %c0_i32_12 : i32
    %16 = arith.extui %15 : i1 to i32
    %c0_i32_13 = arith.constant 0 : i32
    %17 = arith.cmpi ne, %16, %c0_i32_13 : i32
    scf.if %17 {
      %c0_16 = arith.constant 0 : index
      %c0_17 = arith.constant 0 : index
      %23 = vector.load %arg7[%c0_16, %c0_17] : memref<2x128xf32, #tpu.memory_space<vmem>>, vector<2x128xf32>
      %c0_18 = arith.constant 0 : index
      %c0_19 = arith.constant 0 : index
      %24 = vector.load %arg8[%c0_18, %c0_19] : memref<2x32xf32, #tpu.memory_space<vmem>>, vector<2x32xf32>
      %c0_20 = arith.constant 0 : index
      %c0_21 = arith.constant 0 : index
      %c0_22 = arith.constant 0 : index
      %25 = vector.load %arg5[%c0_20, %c0_21, %c0_22] : memref<1x32x128xf32, #tpu.memory_space<vmem>>, vector<1x32x128xf32>
      %26 = vector.shape_cast %25 : vector<1x32x128xf32> to vector<32x128xf32>
      %cst_23 = arith.constant dense<0.000000e+00> : vector<2x128xf32>
      %27 = tpu.matmul %24, %26, %cst_23 {dimension_numbers = #tpu.dot_dimension_numbers<[1], [0], [0], [1], [0, 0, 1, 1], [], []>} : vector<2x32xf32>, vector<32x128xf32>, vector<2x128xf32> -> vector<2x128xf32>
      %28 = arith.addf %23, %27 : vector<2x128xf32>
      %c0_24 = arith.constant 0 : index
      %c0_25 = arith.constant 0 : index
      %29 = vector.load %arg7[%c0_24, %c0_25] : memref<2x128xf32, #tpu.memory_space<vmem>>, vector<2x128xf32>
      tpu.vector_store %arg7[%c0_24, %c0_25], %28 {strides = array<i32>} : memref<2x128xf32, #tpu.memory_space<vmem>>, vector<2x128xf32>,
    } else {
    }
    %c2_i32 = arith.constant 2 : i32
    %18 = arith.cmpi eq, %arg1, %c2_i32 : i32
    %c0_i32_14 = arith.constant 0 : i32
    %19 = arith.cmpi eq, %arg2, %c0_i32_14 : i32
    %20 = arith.andi %18, %19 : i1
    %21 = arith.extui %20 : i1 to i32
    %c0_i32_15 = arith.constant 0 : i32
    %22 = arith.cmpi ne, %21, %c0_i32_15 : i32
    scf.if %22 {
      %c0_16 = arith.constant 0 : index
      %c0_17 = arith.constant 0 : index
      %23 = vector.load %arg7[%c0_16, %c0_17] : memref<2x128xf32, #tpu.memory_space<vmem>>, vector<2x128xf32>
      %cst_18 = arith.constant 3.000000e+00 : f32
      %24 = vector.broadcast %cst_18 : f32 to vector<2x128xf32>
      %25 = arith.divf %23, %24 : vector<2x128xf32>
      %c0_19 = arith.constant 0 : index
      %c0_20 = arith.constant 0 : index
      %26 = vector.load %arg6[%c0_19, %c0_20] : memref<1x128xf32, #tpu.memory_space<vmem>>, vector<1x128xf32>
      %27 = vector.broadcast %26 : vector<1x128xf32> to vector<2x128xf32>
      %28 = arith.addf %25, %27 : vector<2x128xf32>
      %c0_21 = arith.constant 0 : index
      %c0_22 = arith.constant 0 : index
      %29 = vector.load %arg7[%c0_21, %c0_22] : memref<2x128xf32, #tpu.memory_space<vmem>>, vector<2x128xf32>
      tpu.vector_store %arg7[%c0_21, %c0_22], %28 {strides = array<i32>} : memref<2x128xf32, #tpu.memory_space<vmem>>, vector<2x128xf32>,
    } else {
    }
    return
  }
  func.func @transform_0(%arg0: i32, %arg1: i32, %arg2: i32) -> (i32, i32) {
    %c0_i32 = arith.constant 0 : i32
    return %arg0, %arg2 : i32, i32
  }
  func.func @transform_1(%arg0: i32, %arg1: i32, %arg2: i32) -> (i32, i32, i32) {
    %c0_i32 = arith.constant 0 : i32
    %c0_i32_0 = arith.constant 0 : i32
    return %arg1, %arg2, %c0_i32 : i32, i32, i32
  }
  func.func @transform_2(%arg0: i32, %arg1: i32, %arg2: i32) -> (i32, i32, i32) {
    %c0_i32 = arith.constant 0 : i32
    %c0_i32_0 = arith.constant 0 : i32
    %c0_i32_1 = arith.constant 0 : i32
    return %arg1, %c0_i32, %c0_i32_0 : i32, i32, i32
  }
  func.func @transform_3(%arg0: i32, %arg1: i32, %arg2: i32) -> (i32, i32) {
    %c0_i32 = arith.constant 0 : i32
    %c0_i32_0 = arith.constant 0 : i32
    %c0_i32_1 = arith.constant 0 : i32
    return %c0_i32, %c0_i32_0 : i32, i32
  }
  func.func @transform_4(%arg0: i32, %arg1: i32, %arg2: i32) -> (i32, i32) {
    %c0_i32 = arith.constant 0 : i32
    %c0_i32_0 = arith.constant 0 : i32
    return %arg0, %c0_i32 : i32, i32
  }
}

</mosaic_0001>

<bundles_post_ra>
// kernel: tpu_custom_call.1
= control target key start
LH: loop header
LB: loop body
LE: loop exit
PB: predicated region body
PF: predicated region fallthrough
CT: control target
= control target key end

     0   :  { %9 = vsyncpa [#allocation4], 0  ;;  %s1189_s0 = inlined_call_operand.hbm [shape: f32[2,16], index: 0, kind: input, shape index: {}]   ;;  %s1190_s1 = inlined_call_operand.hbm [shape: f32[3,16,32], index: 1, kind: input, shape index: {}]   ;;  %s1191_s2 = inlined_call_operand.hbm [shape: f32[3,32,128], index: 2, kind: input, shape index: {}]   ;;  %s1192_s3 = inlined_call_operand.vmem [shape: f32[1,128], index: 3, kind: input, shape index: {}]   ;;  %s1193_s4 = inlined_call_operand.hbm [shape: f32[2,128], index: 4, kind: output, shape index: {}]  }
   0x1   :  { %10 = vsyncpa [#allocation7], 0 }
   0x2   :  { %12 = vsyncpa [#allocation7 + $0x1], 0 }
   0x3   :  { %13 = vsyncpa [#allocation5], 0  ;;  %s954_s15 = smov 0   ;;  %s956_s16 = smov 0  }
   0x4   :  { %s958_s17 = smov 0   ;;  %s960_s18 = smov 0  }
   0x5   :  { %s962_s19 = smov 0   ;;  %s964_s20 = smov 0  }
   0x6 LB: > { %s34_s21 = sadd.s32 1, %s913_s19  ;;  %s75_s22 = sadd.s32 1, %s905_s17  ;;  %s917_s20 = sphi %s964_s20, %s19_s20   ;;  %s913_s19 = sphi %s962_s19, %s1209_s19   ;;  %s909_s18 = sphi %s960_s18, %s1208_s18   ;;  %s905_s17 = sphi %s958_s17, %s1207_s17   ;;  %s901_s16 = sphi %s956_s16, %s1206_s16   ;;  %s897_s15 = sphi %s954_s15, %s1205_s15  }
   0x7   : > { %p36_p0 = scmp.ge.s32.totalorder %s34_s21, 3  ;;  %p82_p1 = scmp.ne.s32.totalorder %s905_s17, %s901_s16 }
   0x8   : > { %p83_p2 = scmp.eq.s32.totalorder %s917_s20, 0  ;;  %p685_p4 = scmp.lt.s32.totalorder %s917_s20, 3 }
   0x9   : > { %s1211_s21 = smov (%p36_p0, %s34_s21), 0  ;;  %s202_s24 = sand.u32 1, %s917_s20  }
   0xa   : > { %p84_p3 = por %p83_p2, %p82_p1  ;;  %s70_s23 = ssub.s32 %s913_s19, %s1211_s21 }
   0xb   : > { %p73_p5 = scmp.eq.s32.totalorder %s70_s23, 0  ;;  %s204_s25 = sand.u32 1, %s905_s17  }
   0xc   : > { %s622_s26 = sshll.u32 %s913_s19, 8  ;;  %s603_s28 = sshll.u32 %s204_s25, 4 }
   0xd   : > { %s998_s27 = scalar_select %p73_p5, %s905_s17, %s75_s22  }
   0xe   : > { %s1003_s5 = scalar_lea.hbm %s1190_s1, %s622_s26  ;;  %p1005_p6 = pnand %p685_p4, %p84_p3 }
   0xf   : > { %s206_s7 = scalar_lea.vmem [#allocation6], %s603_s28  ;;  %s1011_s9 = sshll.u32 %s204_s25, 5 }
  0x10   : > { %s215_s8 = sshll.u32 %s206_s7, 4  ;;  %s1013_s10 = scalar_lea.sflag [#allocation7], %s202_s24  ;;  %s1009_s8 = int_to_ptr.vmem [resolvable:$true] %s215_s8 }
  0x11   : > { %s745_s11 = scalar_lea.hbm %s1003_s5, 256  ;;  %p747_p8 = pneg %p1005_p6 }
  0x12   : > { %p746_p7 = scmp.ne.s32.totalorder %s1003_s5, %s745_s11  ;;  %s750_s14 = scalar_lea.hbm %s1190_s1, 768 }
  0x13   : > { %p751_p11 = scmp.lt.u32.totalorder %s1003_s5, %s1190_s1  ;;  %p752_p12 = scmp.lt.u32.totalorder %s750_s14, %s745_s11 }
  0x14   : > { %p748_p9 = pnand %p747_p8, %p746_p7  ;;  %p754_p0 = scmp.lt.u32.totalorder %s745_s11, %s1003_s5 }
  0x15   : > { %p753_p13 = por %p752_p12, %p751_p11 }
  0x16   : > { %p749_p10 = pneg %p748_p9 }
  0x17   : > { %p755_p1 = por %p754_p0, %p753_p13 }
  0x19   : > { %p756_p2 = pnand %p755_p1, %p749_p10 }
  0x1b   : > { %759 = shalt.err (!%p756_p2)
}
  0x1c   : > { %s760_s24 = scalar_lea.vmem %s1009_s8, 256  ;;  %s919_s25 = smov [#allocation6]  }
  0x1d   : > { %p761_p3 = scmp.ne.s32.totalorder %s1009_s8, %s760_s24  ;;  %s765_s26 = sshll.u32 %s919_s25, 4  ;;  %s766_s26 = int_to_ptr.vmem [resolvable:$false] %s765_s26 }
  0x1e   : > { %s767_s28 = scalar_lea.vmem %s766_s26, 512  ;;  %p768_p7 = scmp.lt.s32.totalorder %s1009_s8, %s766_s26 }
  0x1f   : > { %p763_p4 = pnand %p761_p3, %p747_p8  ;;  %p769_p9 = scmp.lt.s32.totalorder %s767_s28, %s760_s24 }
  0x21   : > { %p764_p5 = pneg %p763_p4  ;;  %p770_p11 = por %p769_p9, %p768_p7 }
  0x23   : > { %p771_p12 = pnand %p770_p11, %p764_p5 }
  0x25   : > { %774 = shalt.err (!%p771_p12)
}
  0x26   : > { %s920_s29 = smov 128   ;;  %s921_s30 = smov 8  }
  0x27   : > { %680 = dma.hbm_to_vmem [thread:$0]  (!%p1005_p6), %s1003_s5, 256, %s1009_s8, %s1013_s10, %s920_s29, %s920_s29, %s921_s30  }
  0x28   : > { %s1045_s7 = sadd.s32 4294967295, %s917_s20   ;;  %p88_p10 = scmp.ne.s32.totalorder %s901_s16, %s897_s15 }
  0x29   : > { %p1194_p13 = scmp.eq.s32.totalorder %s1045_s7, 0  ;;  %p600_p0 = scmp.ge.s32.totalorder %s917_s20, 1 }
  0x2a   : > { %p172_p1 = scmp.lt.s32.totalorder %s917_s20, 4  ;;  %s229_s12 = scalar_lea.vmem [#allocation8], %s1011_s9 }
  0x2b   : > { %p1054_p2 = por %p1194_p13, %p88_p10  ;;  %s236_s13 = sshll.u32 %s229_s12, 4  ;;  %s1071_s13 = int_to_ptr.vmem [resolvable:$true] %s236_s13 }
  0x2c   : > { %p1059_p3 = pnand %p600_p0, %p172_p1  ;;  %s922_s5 = smov [#allocation3]  }
  0x2d   : > { %s1198_s11 = scalar_select %p1054_p2, 1, 0 }
  0x2e   : > { %s1199_s14 = scalar_select %p1059_p3, 1, 0 }
  0x2f   : > { %s188_s8 = sshll.u32 %s922_s5, 4  ;;  %s623_s22 = sshll.u32 %s913_s19, 9  ;;  %s1073_s8 = int_to_ptr.vmem [resolvable:$true] %s188_s8 }
  0x30   : > { %p673_p4 = pneg %p1059_p3  ;;  %s1069_s24 = scalar_lea.hbm %s1191_s2, %s623_s22 }
  0x31   : > { %s775_s25 = scalar_lea.hbm %s1069_s24, 512  ;;  %s780_s12 = scalar_lea.hbm %s1191_s2, 1536 }
  0x32   : > { %p1077_p5 = pnand %p673_p4, %p1194_p13  ;;  %p776_p7 = scmp.ne.s32.totalorder %s1069_s24, %s775_s25 }
  0x33   : > { %p781_p12 = scmp.lt.u32.totalorder %s1069_s24, %s1191_s2  ;;  %p782_p10 = scmp.lt.u32.totalorder %s780_s12, %s775_s25 }
  0x34   : > { %p778_p9 = pnand %p776_p7, %p747_p8  ;;  %p784_p1 = scmp.lt.u32.totalorder %s775_s25, %s1069_s24 }
  0x35   : > { %p783_p0 = por %p782_p10, %p781_p12 }
  0x36   : > { %p779_p11 = pneg %p778_p9 }
  0x37   : > { %p785_p4 = por %p784_p1, %p783_p0 }
  0x39   : > { %p786_p13 = pnand %p785_p4, %p779_p11 }
  0x3b   : > { %789 = shalt.err (!%p786_p13)
}
  0x3c   : > { %s790_s15 = scalar_lea.vmem %s1071_s13, 512  ;;  %s923_s23 = smov [#allocation8]  }
  0x3d   : > { %p791_p7 = scmp.ne.s32.totalorder %s1071_s13, %s790_s15  ;;  %s795_s26 = sshll.u32 %s923_s23, 4  ;;  %s796_s26 = int_to_ptr.vmem [resolvable:$false] %s795_s26 }
  0x3e   : > { %s797_s28 = scalar_lea.vmem %s796_s26, 1024  ;;  %p798_p3 = scmp.lt.s32.totalorder %s1071_s13, %s796_s26 }
  0x3f   : > { %p793_p9 = pnand %p791_p7, %p747_p8  ;;  %p799_p12 = scmp.lt.s32.totalorder %s797_s28, %s790_s15 }
  0x41   : > { %p794_p2 = pneg %p793_p9  ;;  %p800_p10 = por %p799_p12, %p798_p3 }
  0x43   : > { %p801_p0 = pnand %p800_p10, %p794_p2 }
  0x45   : > { %804 = shalt.err (!%p801_p0)
}
  0x46   : > { %683 = dma.hbm_to_vmem [thread:$0]  (!%p1005_p6), %s1069_s24, 512, %s1071_s13, %s1013_s10, %s920_s29, %s920_s29, %s921_s30  }
  0x47   : > { %s805_s5 = scalar_lea.hbm %s1189_s0, 32  ;;  %p807_p13 = pneg %p1077_p5 }
  0x48   : > { %p806_p8 = scmp.ne.s32.totalorder %s1189_s0, %s805_s5  ;;  %p812_p11 = scmp.lt.u32.totalorder %s805_s5, %s1189_s0 }
  0x4a   : > { %p808_p2 = pnand %p807_p13, %p806_p8 }
  0x4c   : > { %p809_p3 = pneg %p808_p2 }
  0x4e   : > { %p814_p1 = pnand %p812_p11, %p809_p3 }
  0x50   : > { %817 = shalt.err (!%p814_p1)
}
  0x51   : > { %s818_s10 = scalar_lea.vmem %s1073_s8, 32  ;;  %p826_p9 = scmp.lt.s32.totalorder %s1073_s8, %s1073_s8 }
  0x52   : > { %p819_p6 = scmp.ne.s32.totalorder %s1073_s8, %s818_s10  ;;  %p827_p12 = scmp.lt.s32.totalorder %s818_s10, %s818_s10 }
  0x54   : > { %p821_p4 = pnand %p819_p6, %p807_p13  ;;  %p828_p10 = por %p827_p12, %p826_p9 }
  0x56   : > { %p822_p7 = pneg %p821_p4 }
  0x58   : > { %p829_p0 = pnand %p828_p10, %p822_p7 }
  0x5a   : > { %832 = shalt.err (!%p829_p0)
}
  0x5b   : > { %676 = dma.hbm_to_vmem [thread:$0]  (!%p1077_p5), %s1189_s0, 32, %s1073_s8, [#allocation4]  }
  0x5c   : > { %p1201_p8 = scmp.ne.s32.totalorder %s1199_s14, 0 }
  0x5d   : > { %p1202_p2 = scmp.eq.s32.totalorder (!%p1201_p8), %s1045_s7, 0 }
  0x5e   : > { %248 = sbr.rel (%p1201_p8) target bundleno = 596 (0x254), region = 36 }
  0x65   : > { %884 = dma.done.wait (%p1202_p2), [#allocation4], 32   ;;  %p1203_p13 = pmov %p1202_p2 }
  0x66   : > { %s254_s13 = sand.u32 1, %s1045_s7   ;;  %s256_s24 = sand.u32 1, %s901_s16  }
  0x67   : > { %886 = vsyncadd (%p1203_p13), [#allocation4], 4294967264  ;;  %s611_s9 = sshll.u32 %s256_s24, 4  ;;  %s255_s26 = scalar_lea.sflag [#allocation7], %s254_s13 }
  0x68   : > { %s258_s28 = scalar_lea.vmem [#allocation6], %s611_s9  ;;  %p1204_p3 = scmp.ne.s32.totalorder %s1198_s11, 0 }
  0x6a   : > { %888 = dma.done.wait (%p1204_p3), %s255_s26, 768  }
  0x6b   : > { %890 = vsyncadd (%p1204_p3), %s255_s26, 4294966528  ;;  %s612_s14 = sshll.u32 %s256_s24, 5  ;;  %p293_p5 = scmp.eq.s32.totalorder %s909_s18, 0 }
  0x6c   : > { %s267_s8 = scalar_lea.vmem [#allocation8], %s612_s14  ;;  %v924_v0 = vmov (%p293_p5), 0.0  }
  0x6d   : > { %298 = sbr.rel (!%p293_p5) target bundleno = 116 (0x74), region = 52  ;;  %299 = vst [vmem:[#allocation9] sm:$0x3] (%p293_p5), %v924_v0 }
  0x74 PF: > { %v307_v1 = vld [vmem:[%s258_s28] sm:$0xff]  ;;  %v308_v2 = vld [vmem:[%s258_s28 + $0x8] sm:$0xff]  ;;  %vm303_vm0 = vcmask 254976   ;;  %v925_v3 = vmov 0.0|0.0   ;;  %v926_v5 = vmov 0.0   ;;  %vm927_vm1 = vmmov 0  }
  0x75   : > { %652 = vmatprep.subr.bf16.mxu0 %v925_v3  ;;  %v653_v4 = vpack.c.bf16 %v308_v2, %v307_v1  ;;  %304 = vst.msk [vmem:[#allocation2] sm:$0x3] %vm303_vm0, %v926_v5  ;;  %638 = vmatprep.mubr.msk.f32.mxu0 %vm927_vm1, %v926_v5  ;;  %v306_v6 = vld [vmem:[#allocation3] sm:$0x3]  ;;  %vm309_vm2 = vcmask 130048   ;;  %v391_v7 = vld [vmem:[%s267_s8] sm:$0xff] }
  0x76   : > { %655 = vmatprep.subr.bf16.mxu1 %v925_v3  ;;  %649 = vmatprep.mubr.msk.f32.mxu1 %vm927_vm1, %v926_v5  ;;  %v392_v8 = vld [vmem:[%s267_s8 + $0x8] sm:$0xff]  ;;  %v393_v10 = vld [vmem:[%s267_s8 + $0x10] sm:$0xff]  ;;  %v394_v11 = vld [vmem:[%s267_s8 + $0x18] sm:$0xff]  ;;  %vm395_vm3 = vcmask 261120   ;;  %p471_p11 = scmp.eq.s32.totalorder %s909_s18, 2 }
  0x77   : > { %654 = vmatpush3.bf16.msra.mxu0 %v653_v4  ;;  %v656_v9 = vpack.c.bf16 %v392_v8, %v391_v7  ;;  %v659_v12 = vpack.c.bf16 %v394_v11, %v393_v10  ;;  %v389_v18 = vld [vmem:[#allocation9] sm:$0x3]  ;;  %v617_v23 = vld [vmem:[%s1192_s3] ss:$0 sm:$0xff] (%p471_p11) }
  0x79   : > { %657 = vmatpush3.bf16.msra.mxu1 %v656_v9 }
  0x7a   : > { %639 = vmatmul.mubr.msk.f32.vlgmr.msra.gmra.mrb[0].mxu0 %vm309_vm2, %v306_v6  ;;  %658 = vmatprep.subr.bf16.mxu1 %v925_v3 }
  0x7c   : > { %v305_v13 = vld [vmem:[#allocation2] sm:$0x3] }
  0x7d   : > { %660 = vmatpush3.bf16.msra.mxu1 %v659_v12 }
 0x14d   : > { %v379_v14 = vpop.f32.mrb[0].mxu0 }
 0x14e   : > { %v383_v15 = vadd.f32 %v379_v14, %v305_v13  ;;  %v640_v16 = vpop.f32.mrb[1].mxu0 }
 0x150   : > { %385 = vst.msk [vmem:[#allocation2] sm:$0x3] %vm303_vm0, %v383_v15 }
 0x157   : > { %v390_v17 = vld [vmem:[#allocation2] sm:$0x3] }
 0x158   : > { %650 = vmatmul.mubr.msk.f32.vlgmr.msra.gmra.mrb[0].mxu1 %vm395_vm3, %v390_v17 }
 0x228   : > { %475 = sbr.rel (!%p471_p11) target bundleno = 571 (0x23b), region = 64 }
 0x22b   : > { %v465_v19 = vpop.f32.mrb[0].mxu1 }
 0x22c   : > { %v469_v20 = vadd.f32 %v465_v19, %v389_v18  ;;  %v651_v21 = vpop.f32.mrb[1].mxu1 }
 0x22e   : > { %470 = vst [vmem:[#allocation9] sm:$0x3] %v469_v20 }
 0x235   : > { %v476_v22 = vld [vmem:[#allocation9] sm:$0x3] }
 0x236   : > { %v478_v24 = vmul.f32 0.33333334, %v476_v22 }
 0x238   : > { %v486_v25 = vadd.f32 %v617_v23, %v478_v24 }
 0x23a   : > { %487 = vst [vmem:[#allocation9] sm:$0x3] %v486_v25 }
 0x23b PF: > { %p687_p1 = scmp.eq.s32.totalorder %s1045_s7, 2  ;;  %s928_s12 = smov [#allocation9]  }
 0x23c   : > { %s497_s18 = sshll.u32 %s928_s12, 4  ;;  %s498_s18 = int_to_ptr.vmem [resolvable:$true] %s497_s18 }
 0x23d   : > { %s833_s5 = scalar_lea.vmem %s498_s18, 32  ;;  %p840_p9 = scmp.lt.s32.totalorder %s498_s18, %s498_s18 }
 0x23e   : > { %p834_p6 = scmp.ne.s32.totalorder %s498_s18, %s833_s5  ;;  %p841_p12 = scmp.lt.s32.totalorder %s833_s5, %s833_s5 }
 0x240   : > { %p835_p4 = pnand %p834_p6, %p687_p1  ;;  %p842_p10 = por %p841_p12, %p840_p9 }
 0x242   : > { %p836_p7 = pneg %p835_p4 }
 0x244   : > { %p843_p0 = pnand %p842_p10, %p836_p7 }
 0x246   : > { %846 = shalt.err (!%p843_p0)
}
 0x247   : > { %s847_s6 = scalar_lea.hbm %s1193_s4, 32 }
 0x248   : > { %p848_p8 = scmp.ne.s32.totalorder %s1193_s4, %s847_s6  ;;  %p853_p3 = scmp.lt.u32.totalorder %s847_s6, %s1193_s4 }
 0x24a   : > { %p849_p2 = pnand %p848_p8, %p687_p1 }
 0x24c   : > { %p850_p13 = pneg %p849_p2 }
 0x24e   : > { %p855_p5 = pnand %p853_p3, %p850_p13 }
 0x250   : > { %858 = shalt.err (!%p855_p5)
}
 0x251   : > { %670 = dma.vmem_to_hbm [thread:$0]  (%p687_p1), %s498_s18, 32, %s1193_s4, [#allocation5]  }
 0x252   : > { %892 = dma.done.wait (%p687_p1), [#allocation5], 32  }
 0x253   : > { %894 = vsyncadd (%p687_p1), [#allocation5], 4294967264 }
 0x254 PF: > { %s19_s20 = sadd.s32 1, %s917_s20   ;;  %s1205_s15 = smov %s901_s16 }
 0x255   : > { %p16_p11 = scmp.ge.s32.totalorder %s19_s20, 5   ;;  %s1206_s16 = smov %s905_s17 }
 0x256   : > { %s1207_s17 = smov %s998_s27  ;;  %s1208_s18 = smov %s913_s19 }
 0x257   : > { %s1209_s19 = smov %s1211_s21  ;;  %18 = sbr.rel (!%p16_p11) target bundleno = 6 (0x6), region = 107 }
 0x25e   :  { %510 = vsyncpa [#allocation4], 1 }
 0x25f   :  { %512 = vsyncpa [#allocation4 + $0x1], 1 }
 0x260   :  { %513 = vsyncpa [#allocation7], 1 }
 0x261   :  { %515 = vsyncpa [#allocation7 + $0x1], 1 }
 0x262   :  { %516 = vsyncpa [#allocation5], 1 }
 0x263   :  { %518 = vsyncpa [#allocation5 + $0x1], 1 }

</bundles_post_ra>
